<compile_context>
chip_gen: v5e
topology: v5e:2x2
jax: 0.10.0
libtpu: 0.0.40
codegen_flags: <defaults>
</compile_context>

<pallas_src>
import math

import jax
import jax.numpy as jnp
from jax.experimental import pallas as pl
from jax.experimental.pallas import tpu as pltpu

MAX_ANGLE = math.pi / 6.0
COS_HALF_MAX = math.cos(MAX_ANGLE / 2.0)   # cos(15 deg)
SIN_HALF_MAX = math.sin(MAX_ANGLE / 2.0)   # sin(15 deg)
_EPS = 1e-12


def _round_up(x, m):
    return ((x + m - 1) // m) * m


def _residual_kernel(x_ref, w1_ref, w2_ref, wh1_ref, wh2_ref, b_ref, out_ref):
    # --- unpack biases (static slices of a small (4,128) f32 tile) -----------
    b = b_ref[...]
    b1 = b[0:1, :]        # (1,128) feature_net layer 1
    b2 = b[1:2, 0:64]     # (1,64)  feature_net layer 2
    bh1 = b[2:3, 0:64]    # (1,64)  fused head layer 1 (rot|trans)
    bh2 = b[3:4, 0:8]     # (1,8)   fused head layer 2 (rot|trans|pad)

    # --- feature_net: Linear(256,128)+ReLU, Linear(128,64)+ReLU --------------
    # bf16 x bf16 -> f32 accumulate. If the producer already emits bf16 the
    # cast below is a no-op (and halves the dominant HBM input stream).
    x = x_ref[...]
    if x.dtype != jnp.bfloat16:
        x = x.astype(jnp.bfloat16)
    h = jnp.dot(x, w1_ref[...], preferred_element_type=jnp.float32) + b1
    h = jnp.maximum(h, 0.0)
    feat = jnp.dot(h.astype(jnp.bfloat16), w2_ref[...],
                   preferred_element_type=jnp.float32) + b2
    feat = jnp.maximum(feat, 0.0)

    # --- fused heads ----------------------------------------------------------
    # layer 1: cols 0:32 = rot hidden, cols 32:64 = trans hidden
    hh = jnp.dot(feat.astype(jnp.bfloat16), wh1_ref[...],
                 preferred_element_type=jnp.float32) + bh1
    hh = jnp.maximum(hh, 0.0)
    # layer 2: block-diagonal weight -> y cols 0:4 = rot, 4:7 = trans, 7 = 0
    y = jnp.dot(hh.astype(jnp.bfloat16), wh2_ref[...],
                preferred_element_type=jnp.float32) + bh2               # (tb,8)

    # --- normalize_quaternion + constrain_residual ----------------------------
    # TODO(synk): normalize_quaternion / clip_rotation / quaternion_magnitude
    # are empty stubs in the reference; standard unit-normalize + angle-clip
    # (with quaternion sign canonicalization) semantics are implemented here.
    lane = jax.lax.broadcasted_iota(jnp.int32, y.shape, 1)   # built once per tile
    rot_mask = lane < 4
    trans_mask = jnp.logical_and(lane >= 4, lane < 7)

    # unit-normalize the quaternion lanes (other lanes zeroed for the reduce)
    rot = jnp.where(rot_mask, y, 0.0)
    rot = rot * jax.lax.rsqrt(jnp.sum(rot * rot, axis=-1, keepdims=True) + _EPS)

    # scalar part w (lane 0) via a static slice (no cross-lane reduce);
    # canonicalize sign so the rotation angle is in [0, pi].
    w = rot[:, 0:1]
    sgn = jnp.where(w < 0.0, -1.0, 1.0)
    rot = rot * sgn
    w = w * sgn

    # angle clip without arccos/cos/sin: w = cos(half_angle) for a unit quat,
    # so clip iff w < cos(MAX_ANGLE/2); ||v|| = sqrt(1 - w^2).
    clipped = w < COS_HALF_MAX                                     # (tb,1)
    v_scale = SIN_HALF_MAX * jax.lax.rsqrt(jnp.maximum(1.0 - w * w, _EPS))
    rot_clipped = jnp.where(
        lane == 0,
        jnp.where(clipped, COS_HALF_MAX, rot),
        jnp.where(clipped, rot * v_scale, rot),
    )

    trans_clipped = jnp.clip(y, -0.1, 0.1)

    out = jnp.where(rot_mask, rot_clipped,
                    jnp.where(trans_mask, trans_clipped, 0.0))     # (tb,8)
    # write only the 7 live lanes straight into the (B,7) output (no wrapper slice)
    out_ref[...] = out[:, 0:7].astype(out_ref.dtype)


def pack_params(params, weight_dtype=jnp.bfloat16):
    """Fuse the 12 per-layer tensors into 4 weights (bf16) + 1 bias pack (f32).

    Pass weight_dtype=jnp.float32 as an escape hatch if downstream pose
    accuracy is sensitive to the bf16 weight quantization.
    """
    (w1, b1, w2, b2, wr1, br1, wr2, br2, wt1, bt1, wt2, bt2) = params

    wh1 = jnp.concatenate([wr1, wt1], axis=1)                      # (64,64)
    bh1 = jnp.concatenate([br1, bt1], axis=1)                      # (1,64)

    wh2 = jnp.zeros((64, 8), jnp.float32)
    wh2 = wh2.at[0:32, 0:4].set(wr2)
    wh2 = wh2.at[32:64, 4:7].set(wt2)                              # (64,8)
    bh2 = jnp.zeros((1, 8), jnp.float32)
    bh2 = bh2.at[:, 0:4].set(br2)
    bh2 = bh2.at[:, 4:7].set(bt2)                                  # (1,8)

    bias = jnp.zeros((4, 128), jnp.float32)
    bias = bias.at[0, :].set(b1[0])
    bias = bias.at[1, 0:64].set(b2[0])
    bias = bias.at[2, 0:64].set(bh1[0])
    bias = bias.at[3, 0:8].set(bh2[0])

    return (w1.astype(weight_dtype), w2.astype(weight_dtype),
            wh1.astype(weight_dtype), wh2.astype(weight_dtype), bias)


def residual_module_forward(geom_features, current_pose, packed_params, *, tb=None):
    """Forward pass. geom_features: (B,256); returns (B,7) = [quat(4)|trans(3)].

    geom_features may be f32 or bf16 (bf16 halves the dominant HBM stream).
    `tb` is the batch tile; default 1024, worth sweeping 1024-4096 for large B
    (all fit comfortably in the default scoped VMEM on v5e/v6e/v7x).
    """
    # current_pose is accepted for API parity with the torch module but is
    # unused by constrain_residual — it is NOT shipped to the kernel.
    del current_pose
    w1, w2, wh1, wh2, bias = packed_params

    B = geom_features.shape[0]
    if tb is None:
        tb = min(1024, _round_up(B, 8))    # big tile: kernel is HBM/overhead-bound
    nb = pl.cdiv(B, tb)                    # ragged last tile: padded read, masked write

    out = pl.pallas_call(
        _residual_kernel,
        out_shape=jax.ShapeDtypeStruct((B, 7), jnp.float32),
        grid=(nb,),
        in_specs=[
            pl.BlockSpec((tb, 256), lambda i: (i, 0)),     # x: streamed per tile
            pl.BlockSpec((256, 128), lambda i: (0, 0)),    # weights stay resident
            pl.BlockSpec((128, 64), lambda i: (0, 0)),
            pl.BlockSpec((64, 64), lambda i: (0, 0)),
            pl.BlockSpec((64, 8), lambda i: (0, 0)),
            pl.BlockSpec((4, 128), lambda i: (0, 0)),
        ],
        out_specs=pl.BlockSpec((tb, 7), lambda i: (i, 0)),
        compiler_params=pltpu.CompilerParams(
            # batch axis is independent -> shard across TensorCores (v7x megacore)
            dimension_semantics=("parallel",),
        ),
    )(geom_features, w1, w2, wh1, wh2, bias)

    return out


def init_params(key):
    """Deterministic parameter init matching the torch module's layer shapes."""
    dims = [
        (256, 128), (128, 64),   # feature_net
        (64, 32), (32, 4),       # rot_net
        (64, 32), (32, 3),       # trans_net
    ]
    params = []
    for (fan_in, fan_out) in dims:
        key, kw, kb = jax.random.split(key, 3)
        bound = 1.0 / math.sqrt(fan_in)  # torch.nn.Linear default init range
        w = jax.random.uniform(kw, (fan_in, fan_out), jnp.float32, -bound, bound)
        b = jax.random.uniform(kb, (1, fan_out), jnp.float32, -bound, bound)
        params.extend([w, b])
    return tuple(params)


def _reference_forward(geom_features, params):
    """Pure-JAX f32 reference (unfused layers, arccos-based clip)."""
    (w1, b1, w2, b2, wr1, br1, wr2, br2, wt1, bt1, wt2, bt2) = params
    h = jax.nn.relu(geom_features @ w1 + b1)
    feat = jax.nn.relu(h @ w2 + b2)
    rot = jax.nn.relu(feat @ wr1 + br1) @ wr2 + br2
    trans = jax.nn.relu(feat @ wt1 + bt1) @ wt2 + bt2

    rot = rot / jnp.sqrt(jnp.sum(rot * rot, axis=-1, keepdims=True) + _EPS)
    w = rot[:, 0:1]
    sgn = jnp.where(w < 0.0, -1.0, 1.0)
    rot = rot * sgn
    w = w * sgn
    half = jnp.arccos(jnp.clip(w, -1.0, 1.0))
    chalf = jnp.minimum(half, MAX_ANGLE / 2.0)
    v = rot[:, 1:4]
    vn = jnp.sqrt(jnp.sum(v * v, axis=-1, keepdims=True) + _EPS)
    rot_c = jnp.concatenate([jnp.cos(chalf), v / vn * jnp.sin(chalf)], axis=1)
    trans_c = jnp.clip(trans, -0.1, 0.1)
    return jnp.concatenate([rot_c, trans_c], axis=1)


if __name__ == "__main__":
    key = jax.random.PRNGKey(0)
    k_feat, k_pose, k_param = jax.random.split(key, 3)

    # B deliberately not a multiple of 8 to exercise the ragged last tile
    # (padded edge read + masked edge writeback, no jnp.pad / output slice).
    B = 13
    geom_features = jax.random.normal(k_feat, (B, 256), jnp.float32)
    current_pose = jax.random.normal(k_pose, (B, 7), jnp.float32)

    params = init_params(k_param)
    packed = pack_params(params)

    out = residual_module_forward(geom_features, current_pose, packed)
    out = jax.block_until_ready(out)

    assert out.shape == (B, 7), out.shape
    assert bool(jnp.all(jnp.isfinite(out)))

    # Loose check against the f32 reference (kernel uses bf16 weights/activations).
    ref = _reference_forward(geom_features, params)
    max_err = float(jnp.max(jnp.abs(out - ref)))
    assert max_err < 5e-2, f"max abs err vs reference: {max_err}"

    print("KERNEL_OK")
</pallas_src>

<mosaic_0001>
module attributes {stable_mosaic.version = 11 : i64} {
  func.func @_residual_kernel(%arg0: i32, %arg1: memref<16x256xf32, #tpu.memory_space<vmem>>, %arg2: memref<256x128xbf16, #tpu.memory_space<vmem>>, %arg3: memref<128x64xbf16, #tpu.memory_space<vmem>>, %arg4: memref<64x64xbf16, #tpu.memory_space<vmem>>, %arg5: memref<64x8xbf16, #tpu.memory_space<vmem>>, %arg6: memref<4x128xf32, #tpu.memory_space<vmem>>, %arg7: memref<16x7xf32, #tpu.memory_space<vmem>>) attributes {dimension_semantics = [#tpu.dimension_semantics<parallel>], iteration_bounds = array<i64: 1>, scalar_prefetch = 0 : i64, scratch_operands = 0 : i64, tpu.core_type = #tpu.core_type<tc>, window_params = [{transform_indices = @transform_0, window_bounds = array<i64: 16, 256>}, {pipeline_mode = #tpu.pipeline_mode<synchronous>, transform_indices = @transform_1, window_bounds = array<i64: 256, 128>}, {pipeline_mode = #tpu.pipeline_mode<synchronous>, transform_indices = @transform_2, window_bounds = array<i64: 128, 64>}, {pipeline_mode = #tpu.pipeline_mode<synchronous>, transform_indices = @transform_3, window_bounds = array<i64: 64, 64>}, {pipeline_mode = #tpu.pipeline_mode<synchronous>, transform_indices = @transform_4, window_bounds = array<i64: 64, 8>}, {pipeline_mode = #tpu.pipeline_mode<synchronous>, transform_indices = @transform_5, window_bounds = array<i64: 4, 128>}, {transform_indices = @transform_6, window_bounds = array<i64: 16, 7>}]} {
    %c0 = arith.constant 0 : index
    %c0_0 = arith.constant 0 : index
    %0 = vector.load %arg6[%c0, %c0_0] : memref<4x128xf32, #tpu.memory_space<vmem>>, vector<4x128xf32>
    %1 = vector.extract_strided_slice %0 {offsets = [0, 0], sizes = [1, 128], strides = [1, 1]} : vector<4x128xf32> to vector<1x128xf32>
    %2 = vector.extract_strided_slice %0 {offsets = [1, 0], sizes = [1, 64], strides = [1, 1]} : vector<4x128xf32> to vector<1x64xf32>
    %3 = vector.extract_strided_slice %0 {offsets = [2, 0], sizes = [1, 64], strides = [1, 1]} : vector<4x128xf32> to vector<1x64xf32>
    %4 = vector.extract_strided_slice %0 {offsets = [3, 0], sizes = [1, 8], strides = [1, 1]} : vector<4x128xf32> to vector<1x8xf32>
    %c0_1 = arith.constant 0 : index
    %c0_2 = arith.constant 0 : index
    %5 = vector.load %arg1[%c0_1, %c0_2] : memref<16x256xf32, #tpu.memory_space<vmem>>, vector<16x256xf32>
    %6 = arith.truncf %5 : vector<16x256xf32> to vector<16x256xbf16>
    %c0_3 = arith.constant 0 : index
    %c0_4 = arith.constant 0 : index
    %7 = vector.load %arg2[%c0_3, %c0_4] : memref<256x128xbf16, #tpu.memory_space<vmem>>, vector<256x128xbf16>
    %cst = arith.constant dense<0.000000e+00> : vector<16x128xf32>
    %8 = tpu.matmul %6, %7, %cst {dimension_numbers = #tpu.dot_dimension_numbers<[1], [0], [0], [1], [0, 0, 1, 1], [], []>} : vector<16x256xbf16>, vector<256x128xbf16>, vector<16x128xf32> -> vector<16x128xf32>
    %9 = vector.broadcast %1 : vector<1x128xf32> to vector<16x128xf32>
    %10 = arith.addf %8, %9 : vector<16x128xf32>
    %cst_5 = arith.constant 0.000000e+00 : f32
    %11 = vector.broadcast %cst_5 : f32 to vector<16x128xf32>
    %12 = arith.maximumf %10, %11 : vector<16x128xf32>
    %13 = arith.truncf %12 : vector<16x128xf32> to vector<16x128xbf16>
    %c0_6 = arith.constant 0 : index
    %c0_7 = arith.constant 0 : index
    %14 = vector.load %arg3[%c0_6, %c0_7] : memref<128x64xbf16, #tpu.memory_space<vmem>>, vector<128x64xbf16>
    %cst_8 = arith.constant dense<0.000000e+00> : vector<16x64xf32>
    %15 = tpu.matmul %13, %14, %cst_8 {dimension_numbers = #tpu.dot_dimension_numbers<[1], [0], [0], [1], [0, 0, 1, 1], [], []>} : vector<16x128xbf16>, vector<128x64xbf16>, vector<16x64xf32> -> vector<16x64xf32>
    %16 = vector.broadcast %2 : vector<1x64xf32> to vector<16x64xf32>
    %17 = arith.addf %15, %16 : vector<16x64xf32>
    %cst_9 = arith.constant 0.000000e+00 : f32
    %18 = vector.broadcast %cst_9 : f32 to vector<16x64xf32>
    %19 = arith.maximumf %17, %18 : vector<16x64xf32>
    %20 = arith.truncf %19 : vector<16x64xf32> to vector<16x64xbf16>
    %c0_10 = arith.constant 0 : index
    %c0_11 = arith.constant 0 : index
    %21 = vector.load %arg4[%c0_10, %c0_11] : memref<64x64xbf16, #tpu.memory_space<vmem>>, vector<64x64xbf16>
    %cst_12 = arith.constant dense<0.000000e+00> : vector<16x64xf32>
    %22 = tpu.matmul %20, %21, %cst_12 {dimension_numbers = #tpu.dot_dimension_numbers<[1], [0], [0], [1], [0, 0, 1, 1], [], []>} : vector<16x64xbf16>, vector<64x64xbf16>, vector<16x64xf32> -> vector<16x64xf32>
    %23 = vector.broadcast %3 : vector<1x64xf32> to vector<16x64xf32>
    %24 = arith.addf %22, %23 : vector<16x64xf32>
    %cst_13 = arith.constant 0.000000e+00 : f32
    %25 = vector.broadcast %cst_13 : f32 to vector<16x64xf32>
    %26 = arith.maximumf %24, %25 : vector<16x64xf32>
    %27 = arith.truncf %26 : vector<16x64xf32> to vector<16x64xbf16>
    %c0_14 = arith.constant 0 : index
    %c0_15 = arith.constant 0 : index
    %28 = vector.load %arg5[%c0_14, %c0_15] : memref<64x8xbf16, #tpu.memory_space<vmem>>, vector<64x8xbf16>
    %cst_16 = arith.constant dense<0.000000e+00> : vector<16x8xf32>
    %29 = tpu.matmul %27, %28, %cst_16 {dimension_numbers = #tpu.dot_dimension_numbers<[1], [0], [0], [1], [0, 0, 1, 1], [], []>} : vector<16x64xbf16>, vector<64x8xbf16>, vector<16x8xf32> -> vector<16x8xf32>
    %30 = vector.broadcast %4 : vector<1x8xf32> to vector<16x8xf32>
    %31 = arith.addf %29, %30 : vector<16x8xf32>
    %32 = tpu.iota {dimensions = array<i32: 1>} : vector<16x8xi32>
    %c4_i32 = arith.constant 4 : i32
    %33 = vector.broadcast %c4_i32 : i32 to vector<16x8xi32>
    %34 = arith.cmpi slt, %32, %33 : vector<16x8xi32>
    %c4_i32_17 = arith.constant 4 : i32
    %35 = vector.broadcast %c4_i32_17 : i32 to vector<16x8xi32>
    %36 = arith.cmpi sge, %32, %35 : vector<16x8xi32>
    %c7_i32 = arith.constant 7 : i32
    %37 = vector.broadcast %c7_i32 : i32 to vector<16x8xi32>
    %38 = arith.cmpi slt, %32, %37 : vector<16x8xi32>
    %39 = arith.andi %36, %38 : vector<16x8xi1>
    %cst_18 = arith.constant 0.000000e+00 : f32
    %40 = vector.broadcast %cst_18 : f32 to vector<16x8xf32>
    %41 = arith.select %34, %31, %40 : vector<16x8xi1>, vector<16x8xf32>
    %42 = arith.mulf %41, %41 : vector<16x8xf32>
    %cst_19 = arith.constant dense<0.000000e+00> : vector<16xf32>
    %43 = vector.multi_reduction <add>, %42, %cst_19 [1] : vector<16x8xf32> to vector<16xf32>
    %44 = vector.shape_cast %43 : vector<16xf32> to vector<16x1xf32>
    %cst_20 = arith.constant 9.99999996E-13 : f32
    %45 = vector.broadcast %cst_20 : f32 to vector<16x1xf32>
    %46 = arith.addf %44, %45 : vector<16x1xf32>
    %47 = math.rsqrt %46 : vector<16x1xf32>
    %48 = vector.broadcast %47 : vector<16x1xf32> to vector<16x8xf32>
    %49 = arith.mulf %41, %48 : vector<16x8xf32>
    %50 = vector.extract_strided_slice %49 {offsets = [0, 0], sizes = [16, 1], strides = [1, 1]} : vector<16x8xf32> to vector<16x1xf32>
    %cst_21 = arith.constant 0.000000e+00 : f32
    %51 = vector.broadcast %cst_21 : f32 to vector<16x1xf32>
    %52 = arith.cmpf olt, %50, %51 : vector<16x1xf32>
    %cst_22 = arith.constant -1.000000e+00 : f32
    %cst_23 = arith.constant 1.000000e+00 : f32
    %53 = vector.broadcast %cst_22 : f32 to vector<16x1xf32>
    %54 = vector.broadcast %cst_23 : f32 to vector<16x1xf32>
    %55 = arith.select %52, %53, %54 : vector<16x1xi1>, vector<16x1xf32>
    %56 = vector.broadcast %55 : vector<16x1xf32> to vector<16x8xf32>
    %57 = arith.mulf %49, %56 : vector<16x8xf32>
    %58 = arith.mulf %50, %55 : vector<16x1xf32>
    %cst_24 = arith.constant 0.965925812 : f32
    %59 = vector.broadcast %cst_24 : f32 to vector<16x1xf32>
    %60 = arith.cmpf olt, %58, %59 : vector<16x1xf32>
    %61 = arith.mulf %58, %58 : vector<16x1xf32>
    %cst_25 = arith.constant 1.000000e+00 : f32
    %62 = vector.broadcast %cst_25 : f32 to vector<16x1xf32>
    %63 = arith.subf %62, %61 : vector<16x1xf32>
    %cst_26 = arith.constant 9.99999996E-13 : f32
    %64 = vector.broadcast %cst_26 : f32 to vector<16x1xf32>
    %65 = arith.maximumf %63, %64 : vector<16x1xf32>
    %66 = math.rsqrt %65 : vector<16x1xf32>
    %cst_27 = arith.constant 0.258819044 : f32
    %67 = vector.broadcast %cst_27 : f32 to vector<16x1xf32>
    %68 = arith.mulf %67, %66 : vector<16x1xf32>
    %c0_i32 = arith.constant 0 : i32
    %69 = vector.broadcast %c0_i32 : i32 to vector<16x8xi32>
    %70 = arith.cmpi eq, %32, %69 : vector<16x8xi32>
    %cst_28 = arith.constant 0.965925812 : f32
    %71 = vector.shape_cast %60 : vector<16x1xi1> to vector<16x1xi1>
    %72 = vector.broadcast %71 : vector<16x1xi1> to vector<16x8xi1>
    %73 = vector.broadcast %cst_28 : f32 to vector<16x8xf32>
    %74 = arith.select %72, %73, %57 : vector<16x8xi1>, vector<16x8xf32>
    %75 = vector.broadcast %68 : vector<16x1xf32> to vector<16x8xf32>
    %76 = arith.mulf %57, %75 : vector<16x8xf32>
    %77 = vector.shape_cast %60 : vector<16x1xi1> to vector<16x1xi1>
    %78 = vector.broadcast %77 : vector<16x1xi1> to vector<16x8xi1>
    %79 = arith.select %78, %76, %57 : vector<16x8xi1>, vector<16x8xf32>
    %80 = arith.select %70, %74, %79 : vector<16x8xi1>, vector<16x8xf32>
    %cst_29 = arith.constant -1.000000e-01 : f32
    %cst_30 = arith.constant 1.000000e-01 : f32
    %81 = vector.broadcast %cst_29 : f32 to vector<16x8xf32>
    %82 = arith.maximumf %81, %31 : vector<16x8xf32>
    %83 = vector.broadcast %cst_30 : f32 to vector<16x8xf32>
    %84 = arith.minimumf %83, %82 : vector<16x8xf32>
    %cst_31 = arith.constant 0.000000e+00 : f32
    %85 = vector.broadcast %cst_31 : f32 to vector<16x8xf32>
    %86 = arith.select %39, %84, %85 : vector<16x8xi1>, vector<16x8xf32>
    %87 = arith.select %34, %80, %86 : vector<16x8xi1>, vector<16x8xf32>
    %88 = vector.extract_strided_slice %87 {offsets = [0, 0], sizes = [16, 7], strides = [1, 1]} : vector<16x8xf32> to vector<16x7xf32>
    %c0_32 = arith.constant 0 : index
    %c0_33 = arith.constant 0 : index
    %89 = vector.load %arg7[%c0_32, %c0_33] : memref<16x7xf32, #tpu.memory_space<vmem>>, vector<16x7xf32>
    tpu.vector_store %arg7[%c0_32, %c0_33], %88 {strides = array<i32>} : memref<16x7xf32, #tpu.memory_space<vmem>>, vector<16x7xf32>,
    return
  }
  func.func @transform_0(%arg0: i32) -> (i32, i32) {
    %c0_i32 = arith.constant 0 : i32
    %c0_i32_0 = arith.constant 0 : i32
    return %arg0, %c0_i32 : i32, i32
  }
  func.func @transform_1(%arg0: i32) -> (i32, i32) {
    %c0_i32 = arith.constant 0 : i32
    %c0_i32_0 = arith.constant 0 : i32
    %c0_i32_1 = arith.constant 0 : i32
    return %c0_i32, %c0_i32_0 : i32, i32
  }
  func.func @transform_2(%arg0: i32) -> (i32, i32) {
    %c0_i32 = arith.constant 0 : i32
    %c0_i32_0 = arith.constant 0 : i32
    %c0_i32_1 = arith.constant 0 : i32
    return %c0_i32, %c0_i32_0 : i32, i32
  }
  func.func @transform_3(%arg0: i32) -> (i32, i32) {
    %c0_i32 = arith.constant 0 : i32
    %c0_i32_0 = arith.constant 0 : i32
    %c0_i32_1 = arith.constant 0 : i32
    return %c0_i32, %c0_i32_0 : i32, i32
  }
  func.func @transform_4(%arg0: i32) -> (i32, i32) {
    %c0_i32 = arith.constant 0 : i32
    %c0_i32_0 = arith.constant 0 : i32
    %c0_i32_1 = arith.constant 0 : i32
    return %c0_i32, %c0_i32_0 : i32, i32
  }
  func.func @transform_5(%arg0: i32) -> (i32, i32) {
    %c0_i32 = arith.constant 0 : i32
    %c0_i32_0 = arith.constant 0 : i32
    %c0_i32_1 = arith.constant 0 : i32
    return %c0_i32, %c0_i32_0 : i32, i32
  }
  func.func @transform_6(%arg0: i32) -> (i32, i32) {
    %c0_i32 = arith.constant 0 : i32
    %c0_i32_0 = arith.constant 0 : i32
    return %arg0, %c0_i32 : i32, i32
  }
}

</mosaic_0001>

<bundles_post_ra>
// kernel: tpu_custom_call.1
= control target key start
LH: loop header
LB: loop body
LE: loop exit
PB: predicated region body
PF: predicated region fallthrough
CT: control target
= control target key end

     0   :  { %11 = vsyncpa [#allocation3], 0  ;;  %s738_s24 = smov [#allocation2]   ;;  %s739_s26 = smov 64   ;;  %s898_s0 = inlined_call_operand.vmem [shape: f32[13,256], index: 0, kind: input, shape index: {}]   ;;  %s899_s1 = inlined_call_operand.hbm [shape: bf16[256,128], index: 1, kind: input, shape index: {}]   ;;  %s900_s2 = inlined_call_operand.vmem [shape: bf16[128,64], index: 2, kind: input, shape index: {}]   ;;  %s901_s3 = inlined_call_operand.vmem [shape: bf16[64,64], index: 3, kind: input, shape index: {}]   ;;  %s902_s4 = inlined_call_operand.vmem [shape: bf16[64,8], index: 4, kind: input, shape index: {}]   ;;  %s903_s5 = inlined_call_operand.vmem [shape: f32[4,128], index: 5, kind: input, shape index: {}]   ;;  %s904_s6 = inlined_call_operand.vmem [shape: f32[13,7], index: 6, kind: output, shape index: {}]  }
   0x1   :  { %s18_s23 = sshll.u32 %s899_s1, 4  ;;  %s20_s25 = sshll.u32 %s738_s24, 4  ;;  %s19_s23 = int_to_ptr.hbm [resolvable:$true] %s18_s23  ;;  %s21_s25 = int_to_ptr.vmem [resolvable:$true] %s20_s25 }
   0x2   :  { %s740_s27 = smov 4  }
   0x3   :  { %26 = dma.hbm_to_vmem [thread:$0]  %s19_s23, 2048, %s21_s25, [#allocation3], %s739_s26, %s739_s26, %s740_s27  }
   0x4   :  { %736 = dma.done.wait [#allocation3], 2048  }
   0x5   :  { %737 = vsyncadd [#allocation3], 4294965248  ;;  %v666_v0 = vld [vmem:[#allocation2 + $0x38] sm:$0xff]  ;;  %v665_v2 = vld [vmem:[#allocation2 + $0x30] sm:$0xff]  ;;  %vm322_vm0 = vcmask 523264   ;;  %vm403_vm2 = vcmask 64512  }
   0x6   :  { %v674_v1 = vld [vmem:[#allocation2 + $0x78] sm:$0xff]  ;;  %176 = vmatpush.bf16.msra.mxu0 %v666_v0  ;;  %v673_v3 = vld [vmem:[#allocation2 + $0x70] sm:$0xff]  ;;  %v664_v4 = vld [vmem:[#allocation2 + $0x28] sm:$0xff] }
   0x7   :  { %190 = vmatpush.bf16.msra.mxu1 %v674_v1  ;;  %v672_v5 = vld [vmem:[#allocation2 + $0x68] sm:$0xff]  ;;  %v682_v6 = vld [vmem:[%s900_s2 + $0x38] sm:$0xff]  ;;  %v681_v7 = vld [vmem:[%s900_s2 + $0x30] sm:$0xff] }
   0x8   :  { %272 = vmatpush.bf16.msra.mxu2 %v682_v6  ;;  %v663_v8 = vld [vmem:[#allocation2 + $0x20] sm:$0xff]  ;;  %v680_v10 = vld [vmem:[%s900_s2 + $0x28] sm:$0xff]  ;;  %v662_v11 = vld [vmem:[#allocation2 + $0x18] sm:$0xff] }
   0x9   :  { %v671_v9 = vld [vmem:[#allocation2 + $0x60] sm:$0xff]  ;;  %v670_v12 = vld [vmem:[#allocation2 + $0x58] sm:$0xff]  ;;  %v661_v14 = vld [vmem:[#allocation2 + $0x10] sm:$0xff] }
   0xa   :  { %177 = vmatpush.bf16.msra.mxu0 %v665_v2  ;;  %v679_v13 = vld [vmem:[%s900_s2 + $0x20] sm:$0xff]  ;;  %v669_v15 = vld [vmem:[#allocation2 + $0x50] sm:$0xff]  ;;  %v660_v16 = vld [vmem:[#allocation2 + $0x8] sm:$0xff] }
   0xb   :  { %191 = vmatpush.bf16.msra.mxu1 %v673_v3  ;;  %v668_v17 = vld [vmem:[#allocation2 + $0x48] sm:$0xff]  ;;  %v659_v18 = vld [vmem:[#allocation2] sm:$0xff]  ;;  %v43_v21 = vld [vmem:[%s898_s0 + $0x10] sm:$0xff]  ;;  %v393_v3 = vlaneseq }
   0xc   :  { %273 = vmatpush.bf16.msra.mxu2 %v681_v7  ;;  %v667_v19 = vld [vmem:[#allocation2 + $0x40] sm:$0xff]  ;;  %v42_v22 = vld [vmem:[%s898_s0 + $0x8] sm:$0xff]  ;;  %v44_v23 = vld [vmem:[%s898_s0 + $0x18] sm:$0xff] }
   0xd   :  { %v41_v20 = vld [vmem:[%s898_s0] sm:$0xff]  ;;  %v46_v25 = vpack.c.bf16 %v44_v23, %v42_v22  ;;  %v678_v26 = vld [vmem:[%s900_s2 + $0x18] sm:$0xff]  ;;  %v677_v27 = vld [vmem:[%s900_s2 + $0x10] sm:$0xff] }
   0xe   :  { %178 = vmatpush.bf16.msra.mxu0 %v664_v4  ;;  %v45_v24 = vpack.c.bf16 %v43_v21, %v41_v20  ;;  %v676_v28 = vld [vmem:[%s900_s2 + $0x8] sm:$0xff]  ;;  %v675_v29 = vld [vmem:[%s900_s2] sm:$0xff]  ;;  %v686_v43 = vld [vmem:[%s901_s3 + $0x18] sm:$0xff]  ;;  %v846_v4 = vand.u32 127, %v393_v3 }
   0xf   :  { %192 = vmatpush.bf16.msra.mxu1 %v672_v5  ;;  %v40_v30 = vld [vmem:[%s903_s5] sm:$0xf]  ;;  %330 = vmatpush.bf16.msra.mxu3 %v686_v43  ;;  %v685_v44 = vld [vmem:[%s901_s3 + $0x10] sm:$0xff]  ;;  %v684_v45 = vld [vmem:[%s901_s3 + $0x8] sm:$0xff] }
  0x10   :  { %274 = vmatpush.bf16.msra.mxu2 %v680_v10  ;;  %v79_v33 = vperm.slane %v40_v30, 0  ;;  %v683_v46 = vld [vmem:[%s901_s3] sm:$0xff]  ;;  %v690_v47 = vld [vmem:[%s902_s4 + $0x18] sm:$0xff]  ;;  %v223_v49 = vperm.slane %v40_v30, 1  ;;  %v689_v56 = vld [vmem:[%s902_s4 + $0x10] sm:$0xff]  ;;  %v297_v60 = vperm.slane %v40_v30, 2 }
  0x11   :  { %v688_v57 = vld [vmem:[%s902_s4 + $0x8] sm:$0xff]  ;;  %v687_v58 = vld [vmem:[%s902_s4] sm:$0xff]  ;;  %v351_v5 = vperm.slane %v40_v30, 3  ;;  %vm395_vm1 = vcmp.lt.s32.totalorder %v846_v4, 4 }
  0x12   :  { %179 = vmatpush.bf16.msra.mxu0 %v663_v8 }
  0x13   :  { %193 = vmatpush.bf16.msra.mxu1 %v671_v9  ;;  %331 = vmatpush.bf16.msra.mxu3 %v685_v44 }
  0x14   :  { %275 = vmatpush.bf16.msra.mxu2 %v679_v13 }
  0x16   :  { %180 = vmatpush.bf16.msra.mxu0 %v662_v11 }
  0x17   :  { %194 = vmatpush.bf16.msra.mxu1 %v670_v12  ;;  %332 = vmatpush.bf16.msra.mxu3 %v684_v45 }
  0x18   :  { %276 = vmatpush.bf16.msra.mxu2 %v678_v26 }
  0x1a   :  { %181 = vmatpush.bf16.msra.mxu0 %v661_v14 }
  0x1b   :  { %195 = vmatpush.bf16.msra.mxu1 %v669_v15  ;;  %333 = vmatpush.bf16.msra.mxu3 %v683_v46 }
  0x1c   :  { %277 = vmatpush.bf16.msra.mxu2 %v677_v27 }
  0x1e   :  { %182 = vmatpush.bf16.msra.mxu0 %v660_v16  ;;  %v741_v16 = vmov 0  }
  0x1f   :  { %196 = vmatpush.bf16.msra.mxu1 %v668_v17  ;;  %383 = vmatpush.bf16.msrb.mxu3 %v690_v47 }
  0x20   :  { %278 = vmatpush.bf16.msra.mxu2 %v676_v28  ;;  %696 = vset.pattern.permute.xlu1 %v741_v16 }
  0x21   :  { %703 = vset.pattern.permute.xlu0 %v741_v16  ;;  %702 = vset.pattern.permute.xlu2 %v741_v16 }
  0x22   :  { %183 = vmatpush.bf16.msra.mxu0 %v659_v18 }
  0x23   :  { %197 = vmatpush.bf16.msra.mxu1 %v667_v19  ;;  %384 = vmatpush.bf16.msrb.mxu3 %v689_v56 }
  0x24   :  { %279 = vmatpush.bf16.msra.mxu2 %v675_v29 }
  0x25   :  { %184 = vmatmul.bf16.vlgmr.msra.gmra.mxu0 %v45_v24 }
  0x26   :  { %198 = vmatmul.bf16.vlgmr.msra.gmra.mxu1 %v46_v25 }
  0x27   :  { %385 = vmatpush.bf16.msrb.mxu3 %v688_v57 }
  0x2b   :  { %386 = vmatpush.bf16.msrb.mxu3 %v687_v58 }
  0xa2   :  { %v185_v31 = vpop.f32.mrf.mxu0 }
  0xa3   :  { %v199_v32 = vpop.f32.mrf.mxu1  ;;  %v186_v34 = vadd.f32 %v185_v31, %v79_v33 }
  0xa5   :  { %v200_v36 = vadd.f32 %v199_v32, %v186_v34  ;;  %v742_v34 = vmov 1.0  }
  0xa7   :  { %v204_v40 = vmax.f32 %v200_v36, 0.0 }
  0xaa   :  { %v187_v35 = vpop.f32.mrf.mxu0 }
  0xab   :  { %v188_v37 = vadd.f32 %v187_v35, %v79_v33  ;;  %v201_v38 = vpop.f32.mrf.mxu1 }
  0xad   :  { %v202_v39 = vadd.f32 %v201_v38, %v188_v37 }
  0xaf   :  { %v205_v41 = vmax.f32 %v202_v39, 0.0 }
  0xb1   :  { %v206_v42 = vpack.c.bf16 %v205_v41, %v204_v40 }
  0xb3   :  { %280 = vmatmul.bf16.vlgmr.msra.gmra.mxu2 %v206_v42 }
 0x136   :  { %v281_v48 = vpop.f32.mrf.mxu2 }
 0x137   :  { %v282_v50 = vadd.f32 %v281_v48, %v223_v49 }
 0x139   :  { %v286_v53 = vmax.f32 %v282_v50, 0.0 }
 0x13e   :  { %v283_v51 = vpop.f32.mrf.mxu2 }
 0x13f   :  { %v284_v52 = vadd.f32 %v283_v51, %v223_v49 }
 0x141   :  { %v287_v54 = vmax.f32 %v284_v52, 0.0 }
 0x143   :  { %v288_v55 = vpack.c.bf16 %v287_v54, %v286_v53 }
 0x145   :  { %639 = vmatmul.msk.bf16.vlgmr.msra.gmra.mxu3 %vm322_vm0, %v288_v55 }
 0x1c8   :  { %v335_v59 = vpop.f32.mrf.mxu3 }
 0x1c9   :  { %v336_v61 = vadd.f32 %v335_v59, %v297_v60 }
 0x1cb   :  { %v340_v0 = vmax.f32 %v336_v61, 0.0 }
 0x1d0   :  { %v337_v62 = vpop.f32.mrf.mxu3 }
 0x1d1   :  { %v338_v63 = vadd.f32 %v337_v62, %v297_v60 }
 0x1d3   :  { %v341_v1 = vmax.f32 %v338_v63, 0.0 }
 0x1d5   :  { %v342_v2 = vpack.c.bf16 %v341_v1, %v340_v0 }
 0x1d7   :  { %656 = vmatmul.msk.bf16.vlgmr.msrb.gmra.mxu3 %vm322_vm0, %v342_v2 }
 0x25a   :  { %v388_v6 = vpop.f32.mrf.mxu3 }
 0x25b   :  { %v849_v7 = vadd.f32 %v388_v6, %v351_v5 }
 0x25d   :  { %v399_v8 = vsel %vm395_vm1, %v849_v7, 0.0 }
 0x25e   :  { %v401_v9 = vmul.f32 %v399_v8, %v399_v8 }
 0x260   :  { %v404_v10 = vsel %vm403_vm2, %v401_v9, 0.0 }
 0x261   :  { %405 = vadd.xlane.f32.xlu0 %v404_v10 }
 0x262   :  { %v390_v11 = vpop.f32.mrf.mxu3 }
 0x263   :  { %v854_v12 = vadd.f32 %v390_v11, %v351_v5 }
 0x265   :  { %v400_v13 = vsel %vm395_vm1, %v854_v12, 0.0  ;;  %v658_v9 = vclamps-f32 %v854_v12, 0.1 }
 0x266   :  { %v402_v14 = vmul.f32 %v400_v13, %v400_v13 }
 0x268   :  { %v407_v15 = vsel %vm403_vm2, %v402_v14, 0.0 }
 0x269   :  { %408 = vadd.xlane.f32.xlu0 %v407_v15 }
 0x2d4   :  { %v406_v17 = vpop.xlane.xlu0 %405 }
 0x2d5   :  { %v410_v18 = vadd.f32 1e-12, %v406_v17 }
 0x2d7   :  { %704 = vrsqrt.f32 %v410_v18  ;;  %vm418_vm4 = vweird.f32 %v410_v18 }
 0x2dc   :  { %v409_v19 = vpop.xlane.xlu0 %408 }
 0x2dd   :  { %v705_v20 = vpop.eup %704  ;;  %v411_v21 = vadd.f32 1e-12, %v409_v19 }
 0x2de   :  { %v413_v22 = vmul.f32 %v705_v20, %v410_v18  ;;  %vm419_vm3 = vweird.f32 %v705_v20 }
 0x2df   :  { %706 = vrsqrt.f32 %v411_v21  ;;  %vm420_vm5 = vmor %vm418_vm4, %vm419_vm3  ;;  %vm428_vm8 = vweird.f32 %v411_v21  ;;  %vm396_vm4 = vcmp.ge.s32.totalorder %v846_v4, 4 }
 0x2e0   :  { %v414_v23 = vmul.f32 %v705_v20, %v413_v22 }
 0x2e2   :  { %v415_v24 = vmul.f32 0.5, %v414_v23 }
 0x2e4   :  { %v416_v25 = vsub.f32 1.5, %v415_v24 }
 0x2e5   :  { %v707_v26 = vpop.eup %706 }
 0x2e6   :  { %v417_v27 = vmul.f32 %v705_v20, %v416_v25  ;;  %v423_v28 = vmul.f32 %v707_v26, %v411_v21  ;;  %vm429_vm7 = vweird.f32 %v707_v26  ;;  %v657_v21 = vclamps-f32 %v849_v7, 0.1 }
 0x2e7   :  { %vm430_vm9 = vmor %vm428_vm8, %vm429_vm7  ;;  %vm482_vm7 = vcmp.eq.s32.totalorder %v846_v4, 0 }
 0x2e8   :  { %v421_v29 = vsel %vm420_vm5, %v705_v20, %v417_v27  ;;  %v424_v30 = vmul.f32 %v707_v26, %v423_v28  ;;  %vm397_vm5 = vcmp.lt.s32.totalorder %v846_v4, 7 }
 0x2e9   :  { %v862_v31 = vmul.f32 %v421_v29, %v399_v8  ;;  %vm872_vm8 = vmand %vm396_vm4, %vm397_vm5 }
 0x2ea   :  { %v425_v32 = vmul.f32 0.5, %v424_v30 }
 0x2eb   :  { %vm434_vm6 = vcmp.lt.f32.partialorder %v862_v31, 0.0 }
 0x2ec   :  { %v426_v33 = vsub.f32 1.5, %v425_v32  ;;  %v436_v35 = vsel %vm434_vm6, -1.0, %v742_v34 }
 0x2ed   :  { %v450_v36 = vmul.f32 %v436_v35, %v862_v31 }
 0x2ee   :  { %v427_v37 = vmul.f32 %v707_v26, %v426_v33 }
 0x2ef   :  { %v454_v38 = vmul.f32 %v450_v36, %v450_v36  ;;  %vm452_vm3 = vcmp.lt.f32.partialorder %v450_v36, 0.9659258 }
 0x2f0   :  { %v431_v39 = vsel %vm430_vm9, %v707_v26, %v427_v37  ;;  %v483_v2 = vsel %vm452_vm3, 1, %v741_v16  ;;  %vm519_vm9 = vcmask 56320   ;;  %v515_v26 = vsel %vm872_vm8, %v657_v21, 0.0 }
 0x2f1   :  { %v433_v40 = vmul.f32 %v431_v39, %v400_v13  ;;  %v456_v41 = vsub.f32 1.0, %v454_v38 }
 0x2f3   :  { %vm435_vm10 = vcmp.lt.f32.partialorder %v433_v40, 0.0  ;;  %v458_v42 = vmax.f32 %v456_v41, 1e-12 }
 0x2f4   :  { %v437_v43 = vsel %vm435_vm10, -1.0, %v742_v34 }
 0x2f5   :  { %708 = vrsqrt.f32 %v458_v42  ;;  %v697_v44 = vpack.i.bf16 %v437_v43, %v436_v35  ;;  %v451_v45 = vmul.f32 %v437_v43, %v433_v40  ;;  %vm466_vm13 = vweird.f32 %v458_v42 }
 0x2f7   :  { %698 = vperm.xlu1 %696, %v697_v44   ;;  %v455_v46 = vmul.f32 %v451_v45, %v451_v45  ;;  %vm453_vm11 = vcmp.lt.f32.partialorder %v451_v45, 0.9659258 }
 0x2f8   :  { %v484_v47 = vsel %vm453_vm11, 1, %v741_v16  ;;  %v516_v16 = vsel %vm872_vm8, %v658_v9, 0.0 }
 0x2f9   :  { %v457_v48 = vsub.f32 1.0, %v455_v46  ;;  %489 = vperm.xlu0 %703, %v484_v47  }
 0x2fb   :  { %v709_v49 = vpop.eup %708  ;;  %v459_v50 = vmax.f32 %v457_v48, 1e-12 }
 0x2fc   :  { %v461_v51 = vmul.f32 %v709_v49, %v458_v42  ;;  %vm467_vm12 = vweird.f32 %v709_v49 }
 0x2fd   :  { %710 = vrsqrt.f32 %v459_v50  ;;  %vm468_vm14 = vmor %vm466_vm13, %vm467_vm12  ;;  %vm476_vm0 = vweird.f32 %v459_v50 }
 0x2fe   :  { %v462_v52 = vmul.f32 %v709_v49, %v461_v51 }
 0x300   :  { %v463_v53 = vmul.f32 0.5, %v462_v52 }
 0x302   :  { %v464_v54 = vsub.f32 1.5, %v463_v53 }
 0x303   :  { %v711_v55 = vpop.eup %710 }
 0x304   :  { %v471_v56 = vmul.f32 %v711_v55, %v459_v50  ;;  %v465_v57 = vmul.f32 %v709_v49, %v464_v54  ;;  %vm477_vm15 = vweird.f32 %v711_v55 }
 0x305   :  { %vm478_vm2 = vmor %vm476_vm0, %vm477_vm15 }
 0x306   :  { %v469_v58 = vsel %vm468_vm14, %v709_v49, %v465_v57  ;;  %v472_v59 = vmul.f32 %v711_v55, %v471_v56 }
 0x307   :  { %v480_v60 = vmul.f32 0.25881904, %v469_v58 }
 0x308   :  { %v473_v61 = vmul.f32 0.5, %v472_v59 }
 0x309   :  { %497 = vperm.xlu1 %696, %v480_v60  }
 0x30a   :  { %v474_v62 = vsub.f32 1.5, %v473_v61 }
 0x30c   :  { %v475_v63 = vmul.f32 %v711_v55, %v474_v62 }
 0x30e   :  { %v479_v0 = vsel %vm478_vm2, %v711_v55, %v475_v63 }
 0x30f   :  { %v481_v1 = vmul.f32 0.25881904, %v479_v0 }
 0x311   :  { %502 = vperm.xlu2 %702, %v481_v1  }
 0x319   :  { %486 = vperm.xlu2 %702, %v483_v2  }
 0x369   :  { %v699_v3 = vpop.permute.xlu1 %698 }
 0x36a   :  { %v701_v5 = vunpack.i.h.bf16 %v699_v3  ;;  %v700_v18 = vunpack.i.l.bf16 %v699_v3 }
 0x36b   :  { %v490_v6 = vpop.permute.xlu0 %489  ;;  %v503_v10 = vpop.permute.xlu2 %502 }
 0x36c   :  { %v449_v8 = vmul.f32 %v701_v5, %v433_v40  ;;  %vm492_vm6 = vcmp.eq.s32.totalorder %v490_v6, 1  ;;  %v448_v20 = vmul.f32 %v700_v18, %v862_v31 }
 0x36e   :  { %v506_v11 = vmul.f32 %v503_v10, %v449_v8  ;;  %v494_v14 = vsel %vm492_vm6, 0.9659258, %v449_v8 }
 0x370   :  { %v508_v15 = vsel %vm492_vm6, %v506_v11, %v449_v8 }
 0x371   :  { %v510_v17 = vsel %vm482_vm7, %v494_v14, %v508_v15 }
 0x372   :  { %v518_v12 = vsel %vm395_vm1, %v510_v17, %v516_v16 }
 0x373   :  { %521 = vst.msk [vmem:[%s904_s6 + $0x8] sm:$0xff] %vm519_vm9, %v518_v12  ;;  %v487_v19 = vpop.permute.xlu2 %486 }
 0x374   :  { %vm491_vm10 = vcmp.eq.s32.totalorder %v487_v19, 1 }
 0x375   :  { %v493_v24 = vsel %vm491_vm10, 0.9659258, %v448_v20 }
 0x37b   :  { %v498_v22 = vpop.permute.xlu1 %497 }
 0x37c   :  { %v505_v23 = vmul.f32 %v498_v22, %v448_v20 }
 0x37e   :  { %v507_v25 = vsel %vm491_vm10, %v505_v23, %v448_v20 }
 0x37f   :  { %v509_v27 = vsel %vm482_vm7, %v493_v24, %v507_v25 }
 0x380   :  { %v517_v28 = vsel %vm395_vm1, %v509_v27, %v515_v26 }
 0x381   :  { %520 = vst.msk [vmem:[%s904_s6] sm:$0xff] %vm519_vm9, %v517_v28 }
 0x382   :  { %526 = vsyncpa [#allocation3], 1 }

</bundles_post_ra>
